<compile_context>
chip_gen: v5e
topology: v5e:2x2
jax: 0.10.0
libtpu: 0.0.40
codegen_flags: <defaults>
</compile_context>

<pallas_src>
import functools

import jax
import jax.numpy as jnp
from jax.experimental import pallas as pl
from jax.experimental.pallas import tpu as pltpu


def _temporal_conv_glu_kernel(x_ref, w_ref, b_ref, out_ref, *,
                              Kt, c_in, c_out, V, lane_chunk):
    """One grid step: Bt batch elements, whole (T, V) extent (chunked on lanes).

    x_ref   : (Bt, c_in, T*V)        bf16 input, NCHW with (T,V) flattened on lanes
    w_ref   : (Kt, 2*c_out, c_in)    bf16 per-tap conv weights (residual folded in)
    b_ref   : (2*c_out, 1)           f32 conv bias
    out_ref : (Bt, c_out, T_out*V)   output, NCHW with (T_out,V) flattened
    """
    Bt = out_ref.shape[0]
    M = out_ref.shape[2]                       # T_out * V (lane-dense)

    # Hoisted once per grid step (tiny): per-tap weights and bias.
    w_taps = [w_ref[k] for k in range(Kt)]     # each (2*c_out, c_in) bf16
    bias = b_ref[...]                          # (2*c_out, 1) f32

    # Static Python loops: every slice / store offset below is a compile-time
    # constant, and each (bi, chunk) iteration ends in a store, so live vector
    # state is bounded by one (2*c_out, lane_chunk) accumulator.
    for bi in range(Bt):
        for c0 in range(0, M, lane_chunk):
            cw = min(lane_chunk, M - c0)       # static chunk width (ragged tail ok)

            # Kt accumulated MXU matmuls (no im2col copy): tap k of the causal
            # conv reads the contiguous lane slice x[:, k*V + c0 : ... + cw].
            acc = None
            for k in range(Kt):
                x_tap = x_ref[bi, :, pl.ds(k * V + c0, cw)]          # (c_in, cw) bf16
                d = jnp.dot(w_taps[k], x_tap,
                            preferred_element_type=jnp.float32)      # (2*c_out, cw) f32
                acc = d if acc is None else acc + d
            acc = acc + bias

            # GLU. The Align residual is already folded into the x_p half of
            # tap Kt-1's weights, so no separate residual load / zero pad here.
            x_p = acc[:c_out, :]
            x_q = acc[c_out:, :]
            out_ref[bi, :, pl.ds(c0, cw)] = (
                x_p * jax.nn.sigmoid(x_q)).astype(out_ref.dtype)


def _vmem_capacity_bytes():
    try:
        return int(pltpu.get_tpu_info().vmem_capacity_bytes)
    except Exception:
        return 128 * 1024 * 1024               # v5e/v6e default


def _pick_batch_block(B, per_elem_bytes, budget_bytes):
    """Largest divisor of B whose double-buffered in+out block fits the budget;
    prefer an even number of grid steps (v7x shards the parallel axis on 2 TCs)
    when that costs at most 2x the steps."""
    fitting = [d for d in range(1, B + 1)
               if B % d == 0 and 2 * d * per_elem_bytes <= budget_bytes]
    if not fitting:
        return 1
    best = max(fitting)
    steps = B // best
    if steps % 2 == 1:
        even = [d for d in fitting if (B // d) % 2 == 0]
        if even:
            cand = max(even)
            if B // cand <= 2 * steps:
                best = cand
    return best


def temporal_conv_layer_glu(x_nchw, w_conv, b_conv, Kt, c_in, c_out,
                            lane_chunk=None):
    """Forward of TemporalConvLayer(act_func='glu') with c_in <= c_out.

    x_nchw : (B, c_in, T, V) float32 (or bf16)
    w_conv : (2*c_out, c_in, Kt, 1)  PyTorch Conv2d weight layout (OIHW)
    b_conv : (2*c_out,)
    returns: (B, c_out, T - Kt + 1, V)  in x_nchw.dtype (NCHW, like the module)
    """
    B, _, T, V = x_nchw.shape
    T_out = T - Kt + 1
    M = T_out * V
    if c_in > c_out:
        raise NotImplementedError("align conv (c_in > c_out) not wired up")

    # Free row-major reshape (no HBM transpose) + bf16 activation stream.
    x_flat = x_nchw.reshape(B, c_in, T * V).astype(jnp.bfloat16)

    # Conv weight (O, I, Kt, 1) -> (Kt, O, I); fold the Align residual (identity
    # on the first c_in rows of the x_p half, tap Kt-1) BEFORE the bf16 cast.
    w_k = jnp.transpose(w_conv[:, :, :, 0].astype(jnp.float32), (2, 0, 1))
    fold = jnp.concatenate(
        [jnp.eye(c_in, dtype=jnp.float32),
         jnp.zeros((2 * c_out - c_in, c_in), jnp.float32)], axis=0)
    w_k = w_k.at[Kt - 1].add(fold).astype(jnp.bfloat16)      # (Kt, 2*c_out, c_in)
    b_k = b_conv.reshape(2 * c_out, 1).astype(jnp.float32)

    # Lane chunking bounds the in-kernel f32 accumulator regardless of T*V.
    if lane_chunk is None:
        lane_chunk = M if M <= 4096 else 2048
    lane_chunk = max(1, min(int(lane_chunk), M))

    # Generation-aware VMEM budgeting: ~1/3 of capacity for the double-buffered
    # in+out blocks (=> ~21 MiB on 64-MiB v7x, ~42 MiB on 128-MiB v5e/v6e).
    vmem_cap = _vmem_capacity_bytes()
    per_elem_bytes = 2 * c_in * T * V + 4 * c_out * M          # bf16 in + f32 out
    budget = max(4 * 1024 * 1024, min(48 * 1024 * 1024, vmem_cap // 3))
    Bt = _pick_batch_block(B, per_elem_bytes, budget)
    grid = (B // Bt,)

    block_bytes = 2 * Bt * per_elem_bytes + 2 * w_k.size + 4 * b_k.size
    vmem_limit = int(min(int(0.75 * vmem_cap),
                         max(32 * 1024 * 1024, 4 * block_bytes)))

    kernel = functools.partial(
        _temporal_conv_glu_kernel,
        Kt=Kt, c_in=c_in, c_out=c_out, V=V, lane_chunk=lane_chunk)

    out_flat = pl.pallas_call(
        kernel,
        out_shape=jax.ShapeDtypeStruct((B, c_out, M), x_nchw.dtype),
        grid=grid,
        in_specs=[
            pl.BlockSpec((Bt, c_in, T * V), lambda i: (i, 0, 0)),
            pl.BlockSpec((Kt, 2 * c_out, c_in), lambda i: (0, 0, 0)),
            pl.BlockSpec((2 * c_out, 1), lambda i: (0, 0)),
        ],
        out_specs=pl.BlockSpec((Bt, c_out, M), lambda i: (i, 0, 0)),
        compiler_params=pltpu.CompilerParams(
            dimension_semantics=("parallel",),
            vmem_limit_bytes=vmem_limit,
        ),
    )(x_flat, w_k, b_k)

    # Free reshape back to NCHW: (B, c_out, T_out*V) -> (B, c_out, T_out, V).
    return out_flat.reshape(B, c_out, T_out, V)


def _reference_glu(x_nchw, w_conv, b_conv, Kt, c_in, c_out):
    """Pure-JAX f32 reference (mirrors the PyTorch module)."""
    B, _, T, V = x_nchw.shape
    if c_in < c_out:
        pad = jnp.zeros((B, c_out - c_in, T, V), x_nchw.dtype)
        aligned = jnp.concatenate([x_nchw, pad], axis=1)
    else:
        aligned = x_nchw
    x_in = aligned[:, :, Kt - 1:, :]
    conv = jax.lax.conv_general_dilated(
        x_nchw, w_conv, window_strides=(1, 1), padding="VALID",
        dimension_numbers=("NCHW", "OIHW", "NCHW"),
    ) + b_conv.reshape(1, -1, 1, 1)
    x_p = conv[:, :c_out]
    x_q = conv[:, c_out:]
    return (x_p + x_in) * jax.nn.sigmoid(x_q)


if __name__ == "__main__":
    # Small, module-consistent shapes: Kt=3, c_in=4, c_out=8, B=2, T=16, V=16.
    Kt, c_in, c_out = 3, 4, 8
    B, T, V = 2, 16, 16

    key = jax.random.PRNGKey(0)
    kx, kw, kb = jax.random.split(key, 3)
    x = jax.random.normal(kx, (B, c_in, T, V), dtype=jnp.float32)
    w_conv = jax.random.normal(kw, (2 * c_out, c_in, Kt, 1), dtype=jnp.float32) * 0.1
    b_conv = jax.random.normal(kb, (2 * c_out,), dtype=jnp.float32) * 0.1

    ref = _reference_glu(x, w_conv, b_conv, Kt, c_in, c_out)

    out = temporal_conv_layer_glu(x, w_conv, b_conv, Kt, c_in, c_out)
    out = jax.block_until_ready(out)
    assert out.shape == (B, c_out, T - Kt + 1, V), out.shape
    # bf16 activations + bf16 (weights + folded residual identity) with f32
    # accumulation -> small deviation vs the f32 reference.
    err = float(jnp.max(jnp.abs(out - ref)))
    assert err < 8e-2, f"mismatch vs reference (default path), max abs err = {err}"

    # Also exercise the lane-chunked path (multiple chunks + ragged tail chunk).
    out2 = temporal_conv_layer_glu(x, w_conv, b_conv, Kt, c_in, c_out, lane_chunk=128)
    out2 = jax.block_until_ready(out2)
    err2 = float(jnp.max(jnp.abs(out2 - ref)))
    assert err2 < 8e-2, f"mismatch vs reference (lane_chunk=128), max abs err = {err2}"

    print("KERNEL_OK")
</pallas_src>

<mosaic_0001>
module attributes {stable_mosaic.version = 11 : i64} {
  func.func @_temporal_conv_glu_kernel(%arg0: i32, %arg1: memref<1x4x256xbf16, #tpu.memory_space<vmem>>, %arg2: memref<3x16x4xbf16, #tpu.memory_space<vmem>>, %arg3: memref<16x1xf32, #tpu.memory_space<vmem>>, %arg4: memref<1x8x224xf32, #tpu.memory_space<vmem>>) attributes {dimension_semantics = [#tpu.dimension_semantics<parallel>], iteration_bounds = array<i64: 2>, scalar_prefetch = 0 : i64, scratch_operands = 0 : i64, tpu.core_type = #tpu.core_type<tc>, window_params = [{transform_indices = @transform_0, window_bounds = array<i64: 1, 4, 256>}, {pipeline_mode = #tpu.pipeline_mode<synchronous>, transform_indices = @transform_1, window_bounds = array<i64: 3, 16, 4>}, {pipeline_mode = #tpu.pipeline_mode<synchronous>, transform_indices = @transform_2, window_bounds = array<i64: 16, 1>}, {transform_indices = @transform_3, window_bounds = array<i64: 1, 8, 224>}]} {
    %c0 = arith.constant 0 : index
    %c0_0 = arith.constant 0 : index
    %c0_1 = arith.constant 0 : index
    %0 = vector.load %arg2[%c0, %c0_0, %c0_1] : memref<3x16x4xbf16, #tpu.memory_space<vmem>>, vector<1x16x4xbf16>
    %1 = vector.shape_cast %0 : vector<1x16x4xbf16> to vector<16x4xbf16>
    %c1 = arith.constant 1 : index
    %c0_2 = arith.constant 0 : index
    %c0_3 = arith.constant 0 : index
    %2 = vector.load %arg2[%c1, %c0_2, %c0_3] : memref<3x16x4xbf16, #tpu.memory_space<vmem>>, vector<1x16x4xbf16>
    %3 = vector.shape_cast %2 : vector<1x16x4xbf16> to vector<16x4xbf16>
    %c2 = arith.constant 2 : index
    %c0_4 = arith.constant 0 : index
    %c0_5 = arith.constant 0 : index
    %4 = vector.load %arg2[%c2, %c0_4, %c0_5] : memref<3x16x4xbf16, #tpu.memory_space<vmem>>, vector<1x16x4xbf16>
    %5 = vector.shape_cast %4 : vector<1x16x4xbf16> to vector<16x4xbf16>
    %c0_6 = arith.constant 0 : index
    %c0_7 = arith.constant 0 : index
    %6 = vector.load %arg3[%c0_6, %c0_7] : memref<16x1xf32, #tpu.memory_space<vmem>>, vector<16x1xf32>
    %c0_8 = arith.constant 0 : index
    %c0_9 = arith.constant 0 : index
    %c0_10 = arith.constant 0 : index
    %7 = vector.load %arg1[%c0_8, %c0_9, %c0_10] : memref<1x4x256xbf16, #tpu.memory_space<vmem>>, vector<1x4x224xbf16>
    %8 = vector.shape_cast %7 : vector<1x4x224xbf16> to vector<4x224xbf16>
    %cst = arith.constant dense<0.000000e+00> : vector<16x224xf32>
    %9 = tpu.matmul %1, %8, %cst {dimension_numbers = #tpu.dot_dimension_numbers<[1], [0], [0], [1], [0, 0, 1, 1], [], []>} : vector<16x4xbf16>, vector<4x224xbf16>, vector<16x224xf32> -> vector<16x224xf32>
    %c0_11 = arith.constant 0 : index
    %c0_12 = arith.constant 0 : index
    %c16 = arith.constant 16 : index
    %10 = vector.load %arg1[%c0_11, %c0_12, %c16] : memref<1x4x256xbf16, #tpu.memory_space<vmem>>, vector<1x4x224xbf16>
    %11 = vector.shape_cast %10 : vector<1x4x224xbf16> to vector<4x224xbf16>
    %cst_13 = arith.constant dense<0.000000e+00> : vector<16x224xf32>
    %12 = tpu.matmul %3, %11, %cst_13 {dimension_numbers = #tpu.dot_dimension_numbers<[1], [0], [0], [1], [0, 0, 1, 1], [], []>} : vector<16x4xbf16>, vector<4x224xbf16>, vector<16x224xf32> -> vector<16x224xf32>
    %13 = arith.addf %9, %12 : vector<16x224xf32>
    %c0_14 = arith.constant 0 : index
    %c0_15 = arith.constant 0 : index
    %c32 = arith.constant 32 : index
    %14 = vector.load %arg1[%c0_14, %c0_15, %c32] : memref<1x4x256xbf16, #tpu.memory_space<vmem>>, vector<1x4x224xbf16>
    %15 = vector.shape_cast %14 : vector<1x4x224xbf16> to vector<4x224xbf16>
    %cst_16 = arith.constant dense<0.000000e+00> : vector<16x224xf32>
    %16 = tpu.matmul %5, %15, %cst_16 {dimension_numbers = #tpu.dot_dimension_numbers<[1], [0], [0], [1], [0, 0, 1, 1], [], []>} : vector<16x4xbf16>, vector<4x224xbf16>, vector<16x224xf32> -> vector<16x224xf32>
    %17 = arith.addf %13, %16 : vector<16x224xf32>
    %18 = vector.broadcast %6 : vector<16x1xf32> to vector<16x224xf32>
    %19 = arith.addf %17, %18 : vector<16x224xf32>
    %20 = vector.extract_strided_slice %19 {offsets = [0, 0], sizes = [8, 224], strides = [1, 1]} : vector<16x224xf32> to vector<8x224xf32>
    %21 = vector.extract_strided_slice %19 {offsets = [8, 0], sizes = [8, 224], strides = [1, 1]} : vector<16x224xf32> to vector<8x224xf32>
    %22 = arith.negf %21 : vector<8x224xf32>
    %23 = math.exp %22 : vector<8x224xf32>
    %cst_17 = arith.constant 1.000000e+00 : f32
    %24 = vector.broadcast %cst_17 : f32 to vector<8x224xf32>
    %25 = arith.addf %24, %23 : vector<8x224xf32>
    %26 = arith.divf %24, %25 : vector<8x224xf32>
    %27 = arith.mulf %20, %26 : vector<8x224xf32>
    %c0_18 = arith.constant 0 : index
    %c0_19 = arith.constant 0 : index
    %c0_20 = arith.constant 0 : index
    %28 = vector.load %arg4[%c0_18, %c0_19, %c0_20] : memref<1x8x224xf32, #tpu.memory_space<vmem>>, vector<1x8x224xf32>
    %29 = vector.shape_cast %28 : vector<1x8x224xf32> to vector<8x224xf32>
    %30 = vector.shape_cast %27 : vector<8x224xf32> to vector<1x8x224xf32>
    tpu.vector_store %arg4[%c0_18, %c0_19, %c0_20], %30 {strides = array<i32>} : memref<1x8x224xf32, #tpu.memory_space<vmem>>, vector<1x8x224xf32>,
    return
  }
  func.func @transform_0(%arg0: i32) -> (i32, i32, i32) {
    %c0_i32 = arith.constant 0 : i32
    %c0_i32_0 = arith.constant 0 : i32
    %c0_i32_1 = arith.constant 0 : i32
    return %arg0, %c0_i32, %c0_i32_0 : i32, i32, i32
  }
  func.func @transform_1(%arg0: i32) -> (i32, i32, i32) {
    %c0_i32 = arith.constant 0 : i32
    %c0_i32_0 = arith.constant 0 : i32
    %c0_i32_1 = arith.constant 0 : i32
    %c0_i32_2 = arith.constant 0 : i32
    return %c0_i32, %c0_i32_0, %c0_i32_1 : i32, i32, i32
  }
  func.func @transform_2(%arg0: i32) -> (i32, i32) {
    %c0_i32 = arith.constant 0 : i32
    %c0_i32_0 = arith.constant 0 : i32
    %c0_i32_1 = arith.constant 0 : i32
    return %c0_i32, %c0_i32_0 : i32, i32
  }
  func.func @transform_3(%arg0: i32) -> (i32, i32, i32) {
    %c0_i32 = arith.constant 0 : i32
    %c0_i32_0 = arith.constant 0 : i32
    %c0_i32_1 = arith.constant 0 : i32
    return %arg0, %c0_i32, %c0_i32_0 : i32, i32, i32
  }
}

</mosaic_0001>

<bundles_post_ra>
// kernel: tpu_custom_call.1
= control target key start
LH: loop header
LB: loop body
LE: loop exit
PB: predicated region body
PF: predicated region fallthrough
CT: control target
= control target key end

     0   :  { %8 = vsyncpa [#allocation3], 0  ;;  %s770_s0 = inlined_call_operand.vmem [shape: bf16[2,4,256], index: 0, kind: input, shape index: {}]   ;;  %s771_s1 = inlined_call_operand.vmem [shape: bf16[3,16,4], index: 1, kind: input, shape index: {}]   ;;  %s772_s2 = inlined_call_operand.vmem [shape: f32[16,1], index: 2, kind: input, shape index: {}]   ;;  %s773_s3 = inlined_call_operand.hbm [shape: f32[2,8,224], index: 3, kind: output, shape index: {}]  }
   0x1   :  { %10 = vsyncpa [#allocation3 + $0x1], 0  ;;  %s652_s12 = smov 0   ;;  %s654_s13 = smov 0  }
   0x2   :  { %s656_s14 = smov 0   ;;  %s658_s15 = smov 0  }
   0x3 LB: > { %s673_s16 = sadd.s32 4294967295, %s627_s15   ;;  %s472_s17 = sadd.s32 4294967294, %s627_s15   ;;  %s627_s15 = sphi %s658_s15, %s779_s15   ;;  %s623_s14 = sphi %s656_s14, %s778_s14   ;;  %s619_s13 = sphi %s654_s13, %s777_s13   ;;  %s615_s12 = sphi %s652_s12, %s776_s12  }
   0x4   : > { %s677_s18 = sadd.s32 1, %s627_s15   ;;  %s91_s19 = sadd.s32 1, %s623_s14 }
   0x5   : > { %s88_s20 = ssub.s32 %s627_s15, %s677_s18  ;;  %p101_p0 = scmp.ne.s32.totalorder %s623_s14, %s619_s13 }
   0x6   : > { %p89_p1 = scmp.eq.s32.totalorder %s88_s20, 0  ;;  %p102_p2 = scmp.eq.s32.totalorder %s673_s16, 1 }
   0x7   : > { %p107_p3 = scmp.ne.s32.totalorder %s619_s13, %s615_s12  ;;  %p108_p4 = scmp.eq.s32.totalorder %s472_s17, 1 }
   0x8   : > { %s688_s21 = scalar_select %p89_p1, %s623_s14, %s91_s19  }
   0x9   : > { %p690_p5 = por %p102_p2, %p101_p0  ;;  %p694_p6 = por %p108_p4, %p107_p3 }
   0xa   : > { %p475_p7 = scmp.ge.s32.totalorder %s627_s15, 1  ;;  %p140_p8 = scmp.lt.s32.totalorder %s627_s15, 3 }
   0xc   : > { %p141_p9 = pnand %p475_p7, %p140_p8 }
   0xd   : > { %p164_p10 = scmp.lt.s32.totalorder (!%p141_p9), %s673_s16, 1  ;;  %s629_s29 = smov (!%p141_p9), 112  }
   0xe   : > { %144 = sbr.rel (%p141_p9) target bundleno = 347 (0x15b), region = 32  ;;  %s630_s30 = smov (!%p141_p9), 96  }
   0xf   : > { %s161_s20 = sand.u32 (!%p141_p9), 1, %s619_s13   ;;  %s585_s9 = scalar_lea.hbm (!%p141_p9), %s773_s3, 32 }
  0x10   : > { %s397_s4 = scalar_lea.sflag (!%p141_p9), [#allocation3], %s161_s20 }
  0x13   : > { %s165_s24 = scalar_select %p164_p10, %s673_s16, 1  ;;  %vm202_vm0 = vcmask 1041408   ;;  %v509_v10 = vld [vmem:[%s771_s1] sm:$0xff]  ;;  %vm198_vm1 = vcmask 31744   ;;  %v179_v11 = vld [vmem:[%s772_s2 + $0x8] sm:$0xff]  ;;  %v631_v12 = vmov 0  }
  0x14   : > { %555 = vset.pattern.permute.xlu2 %v631_v12  ;;  %556 = vset.pattern.permute.xlu0 %v631_v12  ;;  %v178_v14 = vld [vmem:[%s772_s2] sm:$0xff]  ;;  %vm196_vm2 = vcmask 916480   ;;  %v510_v18 = vld [vmem:[%s771_s1 + $0x8] sm:$0xff]  ;;  %vm296_vm3 = vcmask 785408   ;;  %v511_v24 = vld [vmem:[%s771_s1 + $0x10] sm:$0xff] }
  0x15   : > { %s508_s25 = sshll.u32 %s165_s24, 2  ;;  %346 = vperm.xlu2 %555, %v179_v11   ;;  %s476_s24 = sshll.u32 %s161_s20, 4 }
  0x16   : > { %s168_s28 = scalar_lea.vmem %s770_s0, %s508_s25  ;;  %s512_s25 = sshll.u32 %s673_s16, 4 }
  0x17   : > { %v180_v0 = vld [vmem:[%s168_s28] sm:$0xf]  ;;  %s163_s16 = scalar_lea.vmem [#allocation2], %s476_s24 }
  0x18   : > { %187 = vst [vmem:[#allocation1] ss:$4 sm:$0xff] %v180_v0  ;;  %v280_v3 = vld [vmem:[%s168_s28] sm:$0xf]  ;;  %s408_s28 = scalar_lea.hbm %s773_s3, %s512_s25 }
  0x1d   : > { %341 = vperm.xlu2 %555, %v178_v14  }
  0x1f   : > { %v188_v1 = vld.sshfl [vmem:[#allocation1] sm:$0xff pattern:$0x73625140]  ;;  %v190_v2 = vld.sshfl [vmem:[#allocation1 + $0x8] sm:$0xff pattern:$0x73625140] }
  0x20   : > { %192 = vrot.lane.b32.xlu0 %v188_v1, %s629_s29  ;;  %242 = vst [vmem:[#allocation1] ss:$4 sm:$0xff] %v180_v0 }
  0x27   : > { %v243_v4 = vld.sshfl [vmem:[#allocation1] sm:$0xff pattern:$0x73625140]  ;;  %v244_v5 = vld.sshfl [vmem:[#allocation1 + $0x8] sm:$0xff pattern:$0x73625140] }
  0x28   : > { %194 = vrot.lane.b32.xlu0 %v190_v2, %s629_s29  ;;  %287 = vst [vmem:[#allocation1] ss:$4 sm:$0xff] %v280_v3  ;;  %v250_v8 = vsel %vm202_vm0, %v244_v5, 0  ;;  %v248_v9 = vsel %vm202_vm0, %v243_v4, 0  ;;  %s410_s29 = sshll.u32 %s163_s16, 4  ;;  %s411_s29 = int_to_ptr.vmem [resolvable:$true] %s410_s29 }
  0x29   : > { %273 = vmatpush.bf16.msra.mxu3 %v250_v8  ;;  %259 = vmatpush.bf16.msra.mxu2 %v248_v9 }
  0x2c   : > { %494 = vmatmul.msk.bf16.vlgmr.msra.gmra.mxu3 %vm198_vm1, %v509_v10  ;;  %493 = vmatmul.msk.bf16.vlgmr.msra.gmra.mxu2 %vm198_vm1, %v509_v10 }
  0x2f   : > { %v288_v6 = vld.sshfl [vmem:[#allocation1] sm:$0xff pattern:$0x73625140]  ;;  %v290_v7 = vld.sshfl [vmem:[#allocation1 + $0x8] sm:$0xff pattern:$0x73625140] }
  0x30   : > { %292 = vrot.lane.b32.xlu1 %v288_v6, %s630_s30 }
  0x38   : > { %294 = vrot.lane.b32.xlu1 %v290_v7, %s630_s30  ;;  %s412_s30 = sshll.u32 %s408_s28, 4  ;;  %s413_s30 = int_to_ptr.hbm [resolvable:$true] %s412_s30 }
  0x39   : > { %s579_s5 = sshra.s32 %s413_s30, 4  ;;  %s580_s5 = int_to_ptr.hbm [resolvable:$true] %s579_s5 }
  0x3a   : > { %s581_s6 = scalar_lea.hbm %s580_s5, 16  ;;  %p586_p0 = scmp.lt.s32.totalorder %s580_s5, %s773_s3 }
  0x3b   : > { %p582_p11 = scmp.ne.s32.totalorder %s580_s5, %s581_s6  ;;  %p587_p1 = scmp.lt.s32.totalorder %s585_s9, %s581_s6 }
  0x3d   : > { %p583_p12 = pnand %p582_p11, %p690_p5  ;;  %p588_p2 = por %p587_p1, %p586_p0 }
  0x3f   : > { %p584_p13 = pneg %p583_p12 }
  0x41   : > { %p589_p3 = pnand %p588_p2, %p584_p13 }
  0x6f   : > { %v347_v41 = vpop.permute.xlu2 %346 }
  0x77   : > { %v342_v1 = vpop.permute.xlu2 %341 }
  0x92   : > { %v193_v13 = vpop.permute.xlu0 %192 }
  0x9a   : > { %v195_v15 = vpop.permute.xlu0 %194 }
  0x9b   : > { %v207_v16 = vsel %vm202_vm0, %v195_v15, 0  ;;  %v197_v17 = vsel %vm196_vm2, %v193_v13, %v195_v15 }
  0x9c   : > { %230 = vmatpush.bf16.msra.mxu1 %v207_v16  ;;  %v204_v19 = vsel %vm202_vm0, %v197_v17, 0 }
  0x9d   : > { %216 = vmatpush.bf16.msra.mxu0 %v204_v19 }
  0x9f   : > { %488 = vmatmul.msk.bf16.vlgmr.msra.gmra.mxu1 %vm198_vm1, %v510_v18 }
  0xa0   : > { %487 = vmatmul.msk.bf16.vlgmr.msra.gmra.mxu0 %vm198_vm1, %v510_v18 }
  0xa2   : > { %v293_v20 = vpop.permute.xlu1 %292 }
  0xaa   : > { %v295_v21 = vpop.permute.xlu1 %294 }
  0xab   : > { %v305_v22 = vsel %vm202_vm0, %v295_v21, 0  ;;  %v297_v23 = vsel %vm296_vm3, %v293_v20, %v295_v21 }
  0xac   : > { %328 = vmatpush.bf16.msrb.mxu1 %v305_v22  ;;  %v302_v25 = vsel %vm202_vm0, %v297_v23, 0 }
  0xad   : > { %314 = vmatpush.bf16.msrb.mxu0 %v302_v25 }
  0xaf   : > { %500 = vmatmul.msk.bf16.vlgmr.msrb.gmra.mxu1 %vm198_vm1, %v511_v24  ;;  %v275_v30 = vpop.f32.mrf.mxu3  ;;  %v261_v31 = vpop.f32.mrf.mxu2 }
  0xb0   : > { %499 = vmatmul.msk.bf16.vlgmr.msrb.gmra.mxu0 %vm198_vm1, %v511_v24 }
  0xb7   : > { %v277_v34 = vpop.f32.mrf.mxu3  ;;  %v263_v35 = vpop.f32.mrf.mxu2 }
 0x11c   : > { %v232_v26 = vpop.f32.mrf.mxu1 }
 0x11d   : > { %v218_v27 = vpop.f32.mrf.mxu0  ;;  %v276_v54 = vadd.f32 %v275_v30, %v232_v26 }
 0x11e   : > { %v262_v57 = vadd.f32 %v261_v31, %v218_v27 }
 0x124   : > { %v234_v28 = vpop.f32.mrf.mxu1 }
 0x125   : > { %v220_v29 = vpop.f32.mrf.mxu0  ;;  %v278_v36 = vadd.f32 %v277_v34, %v234_v28 }
 0x126   : > { %v264_v37 = vadd.f32 %v263_v35, %v220_v29 }
 0x12c   : > { %v330_v32 = vpop.f32.mrf.mxu1 }
 0x12d   : > { %v316_v33 = vpop.f32.mrf.mxu0  ;;  %v336_v58 = vadd.f32 %v330_v32, %v276_v54 }
 0x12e   : > { %v335_v0 = vadd.f32 %v316_v33, %v262_v57 }
 0x12f   : > { %v350_v7 = vadd.f32 %v342_v1, %v336_v58 }
 0x130   : > { %v349_v10 = vadd.f32 %v342_v1, %v335_v0 }
 0x134   : > { %v332_v38 = vpop.f32.mrf.mxu1 }
 0x135   : > { %v338_v39 = vadd.f32 %v332_v38, %v278_v36  ;;  %v318_v40 = vpop.f32.mrf.mxu0 }
 0x136   : > { %v337_v42 = vadd.f32 %v318_v40, %v264_v37 }
 0x137   : > { %v352_v43 = vadd.f32 %v347_v41, %v338_v39 }
 0x138   : > { %v351_v44 = vadd.f32 %v347_v41, %v337_v42 }
 0x139   : > { %v502_v45 = vmul.f32 -1.442695, %v352_v43 }
 0x13a   : > { %v501_v46 = vmul.f32 -1.442695, %v351_v44 }
 0x13b   : > { %557 = vpow2.f32 %v502_v45 }
 0x13c   : > { %559 = vpow2.f32 %v501_v46 }
 0x141   : > { %v558_v47 = vpop.eup %557 }
 0x142   : > { %v560_v48 = vpop.eup %559  ;;  %v360_v49 = vadd.f32 1.0, %v558_v47 }
 0x143   : > { %v359_v50 = vadd.f32 1.0, %v560_v48 }
 0x144   : > { %561 = vrcp.f32 %v360_v49  ;;  %v387_v60 = vand.u32 2147483648, %v360_v49  ;;  %v385_v63 = vand.u32 2147483647, %v360_v49  ;;  %vm381_vm6 = vweird.f32 %v360_v49 }
 0x145   : > { %563 = vrcp.f32 %v359_v50  ;;  %v372_v61 = vand.u32 2147483648, %v359_v50  ;;  %v370_v3 = vand.u32 2147483647, %v359_v50  ;;  %vm366_vm7 = vweird.f32 %v359_v50 }
 0x146   : > { %v388_v6 = vor.u32 1.1754944e-38, %v387_v60  ;;  %vm386_vm10 = vcmp.eq.f32.partialorder %v385_v63, 8.507059e+37 }
 0x147   : > { %v373_v8 = vor.u32 1.1754944e-38, %v372_v61  ;;  %vm371_vm11 = vcmp.eq.f32.partialorder %v370_v3, 8.507059e+37 }
 0x14a   : > { %v562_v51 = vpop.eup %561 }
 0x14b   : > { %v564_v52 = vpop.eup %563  ;;  %v377_v53 = vmul.f32 %v562_v51, %v360_v49  ;;  %vm382_vm4 = vweird.f32 %v562_v51 }
 0x14c   : > { %v362_v55 = vmul.f32 %v564_v52, %v359_v50  ;;  %vm367_vm5 = vweird.f32 %v564_v52  ;;  %vm383_vm8 = vmor %vm381_vm6, %vm382_vm4 }
 0x14d   : > { %v378_v56 = vsub.f32 1.0, %v377_v53  ;;  %vm368_vm9 = vmor %vm366_vm7, %vm367_vm5 }
 0x14e   : > { %v363_v59 = vsub.f32 1.0, %v362_v55 }
 0x14f   : > { %v379_v62 = vmul.f32 %v562_v51, %v378_v56 }
 0x150   : > { %v364_v2 = vmul.f32 %v564_v52, %v363_v59 }
 0x151   : > { %v380_v4 = vadd.f32 %v562_v51, %v379_v62 }
 0x152   : > { %v365_v5 = vadd.f32 %v564_v52, %v364_v2 }
 0x153   : > { %v384_v9 = vsel %vm383_vm8, %v562_v51, %v380_v4 }
 0x154   : > { %v369_v11 = vsel %vm368_vm9, %v564_v52, %v365_v5  ;;  %v389_v12 = vsel %vm386_vm10, %v388_v6, %v384_v9 }
 0x155   : > { %v374_v13 = vsel %vm371_vm11, %v373_v8, %v369_v11  ;;  %v392_v14 = vmul.f32 %v389_v12, %v350_v7 }
 0x156   : > { %v391_v15 = vmul.f32 %v374_v13, %v349_v10 }
 0x157   : > { %395 = vst.msk [vmem:[%s163_s16 + $0x8] sm:$0xff] %vm296_vm3, %v392_v14 }
 0x158   : > { %393 = vst [vmem:[%s163_s16] sm:$0xff] %v391_v15 }
 0x159   : > { %592 = shalt.err (!%p589_p3)
}
 0x15a   : > { %513 = dma.vmem_to_hbm [thread:$0]  (%p690_p5), %s411_s29, 256, %s413_s30, %s397_s4  }
 0x15b PF: > { %p519_p4 = scmp.ge.s32.totalorder %s627_s15, 2  ;;  %s424_s17 = sand.u32 1, %s615_s12  }
 0x15c   : > { %s425_s19 = scalar_lea.sflag [#allocation3], %s424_s17 }
 0x15d   : > { %p516_p7 = pnand %p519_p4, %p694_p6 }
 0x15f   : > { %p517_p8 = pneg %p516_p7 }
 0x161   : > { %610 = dma.done.wait (%p517_p8), %s425_s19, 256  }
 0x162   : > { %612 = vsyncadd (%p517_p8), %s425_s19, 4294967040  ;;  %p13_p9 = scmp.ge.s32.totalorder %s677_s18, 4   ;;  %s776_s12 = smov %s619_s13 }
 0x163   : > { %s777_s13 = smov %s623_s14  ;;  %s778_s14 = smov %s688_s21 }
 0x164   : > { %s779_s15 = smov %s677_s18  ;;  %15 = sbr.rel (!%p13_p9) target bundleno = 3 (0x3), region = 69 }
 0x169   :  { %431 = vsyncpa [#allocation3], 1 }
 0x16a   :  { %433 = vsyncpa [#allocation3 + $0x1], 1 }

</bundles_post_ra>
